<compile_context>
chip_gen: v7x
topology: tpu7x:2x2x1
jax: 0.10.0
libtpu: 0.0.40
codegen_flags: <defaults>
</compile_context>

<pallas_src>
import math
import functools

import jax
import jax.numpy as jnp
from jax.experimental import pallas as pl
from jax.experimental.pallas import tpu as pltpu


# Explicit scoped-VMEM budget.  Actual double-buffered footprint at the
# default tiles is ~2-4 MiB; 32 MiB leaves headroom for larger tiles while
# staying inside v7x's 64 MiB physical VMEM (v5e/v6e have 128 MiB).
_VMEM_LIMIT_BYTES = 32 * 1024 * 1024


def _pick_tile(dim, target, step):
    """Largest multiple of `step` <= target that divides dim, else dim."""
    if dim <= target:
        return dim
    t = (target // step) * step
    while t >= step:
        if dim % t == 0:
            return t
        t -= step
    return dim


# ---------------------------------------------------------------------------
# Tiled linear projection: y = x @ W^T + b   (W passed pre-transposed)
# ---------------------------------------------------------------------------
def _linear_kernel(x_ref, w_ref, b_ref, o_ref, acc_ref):
    k = pl.program_id(2)

    @pl.when(k == 0)
    def _():
        acc_ref[...] = jnp.zeros_like(acc_ref)

    acc_ref[...] += jnp.dot(x_ref[...], w_ref[...],
                            preferred_element_type=jnp.float32)

    @pl.when(k == pl.num_programs(2) - 1)
    def _():
        o_ref[...] = (acc_ref[...] + b_ref[...]).astype(o_ref.dtype)


def _linear(x, w_t, bias, *, out_dtype,
            tm_target=512, tn_target=512, tk_target=512):
    # Note: on v5e (16 MiB scoped-VMEM default) tk_target=256..384 is a good
    # override; defaults here are sized for v6e/v7x and still fit v5e easily.
    M, K = x.shape
    Kw, N = w_t.shape
    assert K == Kw
    tm = _pick_tile(M, tm_target, step=8)
    tn = _pick_tile(N, tn_target, step=128)
    tk = _pick_tile(K, tk_target, step=128)
    assert M % tm == 0 and N % tn == 0 and K % tk == 0
    grid = (M // tm, N // tn, K // tk)

    return pl.pallas_call(
        _linear_kernel,
        out_shape=jax.ShapeDtypeStruct((M, N), out_dtype),
        grid_spec=pltpu.PrefetchScalarGridSpec(
            num_scalar_prefetch=0,
            grid=grid,
            in_specs=[
                pl.BlockSpec((tm, tk), lambda i, j, k: (i, k)),   # x
                pl.BlockSpec((tk, tn), lambda i, j, k: (k, j)),   # W^T
                pl.BlockSpec((1, tn), lambda i, j, k: (0, j)),    # bias (f32)
            ],
            out_specs=pl.BlockSpec((tm, tn), lambda i, j, k: (i, j)),
            scratch_shapes=[pltpu.VMEM((tm, tn), jnp.float32)],
        ),
        compiler_params=pltpu.CompilerParams(
            dimension_semantics=("parallel", "parallel", "arbitrary"),
            vmem_limit_bytes=_VMEM_LIMIT_BYTES),
    )(x, w_t, bias)


# ---------------------------------------------------------------------------
# Flash-style attention.
#   Inputs are three views of the same (b, s, 3h) QKV array; the head and the
#   q/k/v third are selected via the last-dim block index (no transposes).
#   Masking matches the module: kept scores unchanged, masked scores = -10000.
# ---------------------------------------------------------------------------
def _flash_attn_kernel(*refs, causal, tq, tkv):
    if causal:
        q_ref, k_ref, v_ref, o_ref, m_sc, l_sc, acc_sc = refs
        mask_ref = None
    else:
        mask_ref, q_ref, k_ref, v_ref, o_ref, m_sc, l_sc, acc_sc = refs

    qi = pl.program_id(2)
    ki = pl.program_id(3)

    @pl.when(ki == 0)
    def _():
        m_sc[...] = jnp.full_like(m_sc, -jnp.inf)
        l_sc[...] = jnp.zeros_like(l_sc)
        acc_sc[...] = jnp.zeros_like(acc_sc)

    def _compute():
        qh = q_ref[0]                            # (tq, hd) bf16 (pre-scaled)
        kh = k_ref[0]                            # (tkv, hd) bf16
        vh = v_ref[0]                            # (tkv, hd) bf16

        # Contract on the last axes -> no explicit kh.T transpose.
        scores = jax.lax.dot_general(
            qh, kh, (((1,), (1,)), ((), ())),
            preferred_element_type=jnp.float32)  # (tq, tkv) f32

        if causal:
            # In-kernel left-to-right mask: keep col <= row; single select.
            rows = qi * tq + jax.lax.broadcasted_iota(jnp.int32, (tq, tkv), 0)
            cols = ki * tkv + jax.lax.broadcasted_iota(jnp.int32, (tq, tkv), 1)
            scores = jnp.where(cols <= rows, scores, -10000.0)
        else:
            # Streamed 0/1 mask, single select (== scores*m - 10000*(1-m)).
            scores = jnp.where(mask_ref[...] != 0, scores, -10000.0)

        m_prev = m_sc[...]
        m_new = jnp.maximum(m_prev, jnp.max(scores, axis=-1, keepdims=True))
        alpha = jnp.exp(m_prev - m_new)
        p = jnp.exp(scores - m_new)

        l_sc[...] = alpha * l_sc[...] + jnp.sum(p, axis=-1, keepdims=True)
        acc_sc[...] = alpha * acc_sc[...] + jnp.dot(
            p.astype(vh.dtype), vh, preferred_element_type=jnp.float32)
        m_sc[...] = m_new

    if causal:
        # Skip kv blocks that lie entirely above the diagonal (they contribute
        # exactly zero probability mass); the diagonal block is kept.
        pl.when(ki * tkv <= qi * tq + (tq - 1))(_compute)
    else:
        _compute()

    @pl.when(ki == pl.num_programs(3) - 1)
    def _():
        o_ref[0] = (acc_sc[...] *
                    pl.reciprocal(l_sc[...], approx=True)).astype(o_ref.dtype)


def _flash_attention(qkv, num_heads, head_dim, *, mask=None, causal=True,
                     out_dtype, tq_target=512, tkv_target=1024):
    b, s, three_h = qkv.shape
    h = num_heads * head_dim
    assert three_h == 3 * h

    tq = _pick_tile(s, tq_target, step=128)
    tkv = _pick_tile(s, tkv_target, step=128)
    assert s % tq == 0 and s % tkv == 0

    # Grid: head axis leads the parallel dims (balanced megacore shards on
    # v7x); kv is the reduction axis and stays last / "arbitrary".
    grid = (num_heads, b, s // tq, s // tkv)

    q_spec = pl.BlockSpec((1, tq, head_dim),
                          lambda hi, bi, qi, ki: (bi, qi, hi))
    k_spec = pl.BlockSpec((1, tkv, head_dim),
                          lambda hi, bi, qi, ki: (bi, ki, num_heads + hi))
    v_spec = pl.BlockSpec((1, tkv, head_dim),
                          lambda hi, bi, qi, ki: (bi, ki, 2 * num_heads + hi))
    o_spec = pl.BlockSpec((1, tq, head_dim),
                          lambda hi, bi, qi, ki: (bi, qi, hi))

    in_specs = [q_spec, k_spec, v_spec]
    args = [qkv, qkv, qkv]
    if not causal:
        assert mask is not None
        in_specs = [pl.BlockSpec((tq, tkv),
                                 lambda hi, bi, qi, ki: (qi, ki))] + in_specs
        args = [mask] + args

    kernel = functools.partial(_flash_attn_kernel, causal=causal,
                               tq=tq, tkv=tkv)

    return pl.pallas_call(
        kernel,
        out_shape=jax.ShapeDtypeStruct((b, s, h), out_dtype),
        grid_spec=pltpu.PrefetchScalarGridSpec(
            num_scalar_prefetch=0,
            grid=grid,
            in_specs=in_specs,
            out_specs=o_spec,
            scratch_shapes=[
                pltpu.VMEM((tq, 1), jnp.float32),          # running max
                pltpu.VMEM((tq, 1), jnp.float32),          # running sum
                pltpu.VMEM((tq, head_dim), jnp.float32),   # output accumulator
            ],
        ),
        compiler_params=pltpu.CompilerParams(
            dimension_semantics=("parallel", "parallel", "parallel",
                                 "arbitrary"),
            vmem_limit_bytes=_VMEM_LIMIT_BYTES),
    )(*args)


# ---------------------------------------------------------------------------
# Full forward
# ---------------------------------------------------------------------------
def gpt_moe_self_attention(hidden_states, ltor_mask, params, *, num_heads,
                           causal=True, compute_dtype=jnp.bfloat16):
    """hidden_states: [b, s, h], ltor_mask: [s, s] (1 = keep).

    causal=True generates the left-to-right mask in-kernel (fast path,
    equivalent to the module's tril ltor_mask); causal=False streams the
    provided 0/1 mask into the attention kernel.
    """
    b, s, h = hidden_states.shape
    assert h % num_heads == 0, "hidden_size must divide num_heads"
    hd = h // num_heads
    assert hd % 128 == 0, "head_dim must be a multiple of 128 (lane width)"
    assert s % 8 == 0, "sequence length must be a multiple of 8"

    # Fold 1/sqrt(head_dim) into the query rows of the QKV projection once
    # (f32, before the bf16 cast) -> no per-kv-step rescale in the kernel.
    scale = 1.0 / math.sqrt(hd)
    wqkv = params["wqkv"].astype(jnp.float32)        # (3h, h), rows [q|k|v]
    bqkv = params["bqkv"].astype(jnp.float32)        # (3h,)
    wqkv = wqkv.at[:h, :].multiply(scale)
    bqkv = bqkv.at[:h].multiply(scale)

    x2d = hidden_states.reshape(b * s, h).astype(compute_dtype)
    wqkv_t = wqkv.T.astype(compute_dtype)            # (h, 3h)
    bqkv_row = bqkv[None, :]                         # (1, 3h) f32
    wd_t = params["wdense"].T.astype(compute_dtype)  # (h, h)
    bd_row = params["bdense"].astype(jnp.float32)[None, :]   # (1, h)

    # QKV projection (tiled matmul, bf16 operands, f32 accumulate).
    qkv = _linear(x2d, wqkv_t, bqkv_row, out_dtype=compute_dtype)  # (b*s, 3h)
    qkv = qkv.reshape(b, s, 3 * h)   # free reshape; last dim layout [q|k|v]

    mask = None if causal else ltor_mask.astype(jnp.float32)
    ctx = _flash_attention(qkv, num_heads, hd, mask=mask, causal=causal,
                           out_dtype=compute_dtype)                # (b, s, h)

    # Output projection back to the input dtype (ctx already lane-dense).
    out = _linear(ctx.reshape(b * s, h), wd_t, bd_row,
                  out_dtype=hidden_states.dtype)
    return out.reshape(b, s, h)


def _reference(hidden_states, ltor_mask, params, *, num_heads):
    """Pure-JAX f32 reference mirroring the PyTorch forward (eval mode)."""
    b, s, h = hidden_states.shape
    hn = h // num_heads
    mixed = hidden_states @ params["wqkv"].T + params["bqkv"]       # (b, s, 3h)
    q, k, v = jnp.split(mixed, 3, axis=-1)

    def to_scores(t):
        return t.reshape(b, s, num_heads, hn).transpose(0, 2, 1, 3)  # (b,np,s,hn)

    q, k, v = to_scores(q), to_scores(k), to_scores(v)
    scores = jnp.einsum("bnqd,bnkd->bnqk", q, k) / math.sqrt(hn)
    mask = ltor_mask.reshape(1, 1, s, s)
    scores = scores * mask - 10000.0 * (1.0 - mask)
    probs = jax.nn.softmax(scores, axis=-1)
    ctx = jnp.einsum("bnqk,bnkd->bnqd", probs, v)
    ctx = ctx.transpose(0, 2, 1, 3).reshape(b, s, h)
    return ctx @ params["wdense"].T + params["bdense"]


if __name__ == "__main__":
    # Small, module-consistent shapes; head_dim=128 keeps blocks lane-aligned.
    batch, seq, num_heads, head_dim = 2, 8, 2, 128
    hidden = num_heads * head_dim                     # 256

    key = jax.random.PRNGKey(0)
    k1, k2, k3, k4, k5 = jax.random.split(key, 5)

    # Deterministic synthetic parameters (nn.Linear shapes: weight (out, in)).
    params = {
        "wqkv": 0.05 * jax.random.normal(k1, (3 * hidden, hidden), jnp.float32),
        "bqkv": 0.01 * jax.random.normal(k2, (3 * hidden,), jnp.float32),
        "wdense": 0.05 * jax.random.normal(k3, (hidden, hidden), jnp.float32),
        "bdense": 0.01 * jax.random.normal(k4, (hidden,), jnp.float32),
    }

    hidden_states = jax.random.normal(k5, (batch, seq, hidden), jnp.float32)
    ltor_mask = jnp.tril(jnp.ones((seq, seq), jnp.float32))

    ref = _reference(hidden_states, ltor_mask, params, num_heads=num_heads)

    # Fast path: in-kernel causal mask, above-diagonal kv blocks skipped.
    out = gpt_moe_self_attention(hidden_states, ltor_mask, params,
                                 num_heads=num_heads, causal=True)
    out = jax.block_until_ready(out)
    assert out.shape == (batch, seq, hidden)
    max_err = float(jnp.max(jnp.abs(out - ref)))
    # bf16 matmul operands (f32 accumulation) -> loose tolerance vs f32 ref.
    assert jnp.allclose(out, ref, atol=4e-2, rtol=4e-2), (
        f"causal path mismatch vs reference (max abs err {max_err})")

    # General path: stream the provided 0/1 ltor_mask (select-based masking).
    out_m = gpt_moe_self_attention(hidden_states, ltor_mask, params,
                                   num_heads=num_heads, causal=False)
    out_m = jax.block_until_ready(out_m)
    max_err_m = float(jnp.max(jnp.abs(out_m - ref)))
    assert jnp.allclose(out_m, ref, atol=4e-2, rtol=4e-2), (
        f"masked path mismatch vs reference (max abs err {max_err_m})")

    print("KERNEL_OK")
</pallas_src>

<mosaic_0001>
module attributes {stable_mosaic.version = 11 : i64} {
  func.func @_linear_kernel(%arg0: i32, %arg1: i32, %arg2: i32, %arg3: memref<16x256xbf16, #tpu.memory_space<vmem>>, %arg4: memref<256x384xbf16, #tpu.memory_space<vmem>>, %arg5: memref<1x384xf32, #tpu.memory_space<vmem>>, %arg6: memref<16x384xbf16, #tpu.memory_space<vmem>>, %arg7: memref<16x384xf32, #tpu.memory_space<vmem>>) attributes {dimension_semantics = [#tpu.dimension_semantics<parallel>, #tpu.dimension_semantics<parallel>, #tpu.dimension_semantics<arbitrary>], iteration_bounds = array<i64: 1, 2, 1>, scalar_prefetch = 0 : i64, scratch_operands = 1 : i64, tpu.core_type = #tpu.core_type<tc>, window_params = [{transform_indices = @transform_0, window_bounds = array<i64: 16, 256>}, {transform_indices = @transform_1, window_bounds = array<i64: 256, 384>}, {transform_indices = @transform_2, window_bounds = array<i64: 1, 384>}, {transform_indices = @transform_3, window_bounds = array<i64: 16, 384>}]} {
    %c0_i32 = arith.constant 0 : i32
    %0 = arith.cmpi eq, %arg2, %c0_i32 : i32
    %1 = arith.extui %0 : i1 to i32
    %c0_i32_0 = arith.constant 0 : i32
    %2 = arith.cmpi ne, %1, %c0_i32_0 : i32
    scf.if %2 {
      %cst_10 = arith.constant 0.000000e+00 : f32
      %12 = vector.broadcast %cst_10 : f32 to vector<16x384xf32>
      %c0_11 = arith.constant 0 : index
      %c0_12 = arith.constant 0 : index
      %13 = vector.load %arg7[%c0_11, %c0_12] : memref<16x384xf32, #tpu.memory_space<vmem>>, vector<16x384xf32>
      tpu.vector_store %arg7[%c0_11, %c0_12], %12 {strides = array<i32>} : memref<16x384xf32, #tpu.memory_space<vmem>>, vector<16x384xf32>,
    } else {
    }
    %c0 = arith.constant 0 : index
    %c0_1 = arith.constant 0 : index
    %3 = vector.load %arg7[%c0, %c0_1] : memref<16x384xf32, #tpu.memory_space<vmem>>, vector<16x384xf32>
    %c0_2 = arith.constant 0 : index
    %c0_3 = arith.constant 0 : index
    %4 = vector.load %arg3[%c0_2, %c0_3] : memref<16x256xbf16, #tpu.memory_space<vmem>>, vector<16x256xbf16>
    %c0_4 = arith.constant 0 : index
    %c0_5 = arith.constant 0 : index
    %5 = vector.load %arg4[%c0_4, %c0_5] : memref<256x384xbf16, #tpu.memory_space<vmem>>, vector<256x384xbf16>
    %cst = arith.constant dense<0.000000e+00> : vector<16x384xf32>
    %6 = tpu.matmul %4, %5, %cst {dimension_numbers = #tpu.dot_dimension_numbers<[1], [0], [0], [1], [0, 0, 1, 1], [], []>} : vector<16x256xbf16>, vector<256x384xbf16>, vector<16x384xf32> -> vector<16x384xf32>
    %7 = arith.addf %3, %6 : vector<16x384xf32>
    %c0_6 = arith.constant 0 : index
    %c0_7 = arith.constant 0 : index
    %8 = vector.load %arg7[%c0_6, %c0_7] : memref<16x384xf32, #tpu.memory_space<vmem>>, vector<16x384xf32>
    tpu.vector_store %arg7[%c0_6, %c0_7], %7 {strides = array<i32>} : memref<16x384xf32, #tpu.memory_space<vmem>>, vector<16x384xf32>,
    %c0_i32_8 = arith.constant 0 : i32
    %9 = arith.cmpi eq, %arg2, %c0_i32_8 : i32
    %10 = arith.extui %9 : i1 to i32
    %c0_i32_9 = arith.constant 0 : i32
    %11 = arith.cmpi ne, %10, %c0_i32_9 : i32
    scf.if %11 {
      %c0_10 = arith.constant 0 : index
      %c0_11 = arith.constant 0 : index
      %12 = vector.load %arg7[%c0_10, %c0_11] : memref<16x384xf32, #tpu.memory_space<vmem>>, vector<16x384xf32>
      %c0_12 = arith.constant 0 : index
      %c0_13 = arith.constant 0 : index
      %13 = vector.load %arg5[%c0_12, %c0_13] : memref<1x384xf32, #tpu.memory_space<vmem>>, vector<1x384xf32>
      %14 = vector.broadcast %13 : vector<1x384xf32> to vector<16x384xf32>
      %15 = arith.addf %12, %14 : vector<16x384xf32>
      %16 = arith.truncf %15 : vector<16x384xf32> to vector<16x384xbf16>
      %c0_14 = arith.constant 0 : index
      %c0_15 = arith.constant 0 : index
      %17 = vector.load %arg6[%c0_14, %c0_15] : memref<16x384xbf16, #tpu.memory_space<vmem>>, vector<16x384xbf16>
      tpu.vector_store %arg6[%c0_14, %c0_15], %16 {strides = array<i32>} : memref<16x384xbf16, #tpu.memory_space<vmem>>, vector<16x384xbf16>,
    } else {
    }
    return
  }
  func.func @transform_0(%arg0: i32, %arg1: i32, %arg2: i32) -> (i32, i32) {
    %c0_i32 = arith.constant 0 : i32
    return %arg0, %arg2 : i32, i32
  }
  func.func @transform_1(%arg0: i32, %arg1: i32, %arg2: i32) -> (i32, i32) {
    %c0_i32 = arith.constant 0 : i32
    return %arg2, %arg1 : i32, i32
  }
  func.func @transform_2(%arg0: i32, %arg1: i32, %arg2: i32) -> (i32, i32) {
    %c0_i32 = arith.constant 0 : i32
    %c0_i32_0 = arith.constant 0 : i32
    return %c0_i32, %arg1 : i32, i32
  }
  func.func @transform_3(%arg0: i32, %arg1: i32, %arg2: i32) -> (i32, i32) {
    %c0_i32 = arith.constant 0 : i32
    return %arg0, %arg1 : i32, i32
  }
}

</mosaic_0001>

<bundles_post_ra>
// kernel: tpu_custom_call.1
= control target key start
LH: loop header
LB: loop body
LE: loop exit
PB: predicated region body
PF: predicated region fallthrough
CT: control target
= control target key end

     0   :  { %8 = vsyncpa [#allocation4], 0  ;;  %s1606_s0 = inlined_call_operand.hbm [shape: bf16[16,256], index: 0, kind: input, shape index: {}]   ;;  %s1607_s1 = inlined_call_operand.hbm [shape: bf16[256,768], index: 1, kind: input, shape index: {}]   ;;  %s1608_s2 = inlined_call_operand.vmem [shape: f32[1,768], index: 2, kind: input, shape index: {}]   ;;  %s1609_s3 = inlined_call_operand.hbm [shape: bf16[16,768], index: 3, kind: output, shape index: {}]  }
   0x1   :  { %9 = vsyncpa [#allocation7], 0 }
   0x2   :  { %11 = vsyncpa [#allocation7 + $0x1], 0 }
   0x3   :  { %12 = vsyncpa [#allocation5], 0 }
   0x4   :  { %14 = vsyncpa [#allocation5 + $0x1], 0  ;;  %s1323_s12 = smov 0   ;;  %s1325_s13 = smov 0  }
   0x5   :  { %s1327_s14 = smov 0   ;;  %s1329_s15 = smov 0  }
   0x6   :  { %s1331_s16 = smov 0   ;;  %s1333_s17 = smov 0  }
   0x7 LB: > { %s902_s18 = sadd.s32 4294967295, %s1290_s17   ;;  %s903_s19 = sadd.s32 4294967294, %s1290_s17   ;;  %s1290_s17 = sphi %s1333_s17, %s20_s17   ;;  %s1286_s16 = sphi %s1331_s16, %s1638_s16   ;;  %s1282_s15 = sphi %s1329_s15, %s1637_s15   ;;  %s1278_s14 = sphi %s1327_s14, %s1636_s14   ;;  %s1274_s13 = sphi %s1325_s13, %s1635_s13   ;;  %s1270_s12 = sphi %s1323_s12, %s1634_s12  }
   0x8   : > { %p83_p0 = scmp.ne.s32.totalorder %s1278_s14, %s1274_s13  ;;  %p84_p1 = scmp.eq.s32.totalorder %s1290_s17, 0 }
   0x9   : > { %p89_p2 = scmp.ne.s32.totalorder %s1274_s13, %s1270_s12  ;;  %p1361_p3 = scmp.eq.s32.totalorder %s902_s18, 0 }
   0xa   : > { %p141_p4 = scmp.eq.s32.totalorder %s902_s18, 1  ;;  %p1365_p5 = por %p84_p1, %p83_p0 }
   0xb   : > { %s1616_s21 = scalar_select %p1361_p3, 1, 0 }
   0xc   : > { %p147_p6 = scmp.eq.s32.totalorder %s903_s19, 1  ;;  %p1371_p7 = por %p1361_p3, %p89_p2 }
   0xd   : > { %p1375_p8 = por %p141_p4, %p83_p0  ;;  %p904_p10 = scmp.ge.s32.totalorder %s1290_s17, 1 }
   0xe   : > { %s1618_s23 = scalar_select %p1371_p7, 1, 0 }
   0xf   : > { %s1619_s24 = scalar_select %p1375_p8, 1, 0 }
  0x10   : > { %p1379_p9 = por %p147_p6, %p89_p2  ;;  %p154_p11 = scmp.lt.s32.totalorder %s1290_s17, 3 }
  0x11   : > { %s1292_s27 = smov [#allocation3]   ;;  %p1019_p1 = scmp.lt.s32.totalorder %s1290_s17, 2 }
  0x12   : > { %s1620_s25 = scalar_select %p1379_p9, 1, 0 }
  0x13   : > { %p1385_p12 = pnand %p904_p10, %p154_p11  ;;  %s172_s28 = sshll.u32 %s1292_s27, 4  ;;  %s1389_s28 = int_to_ptr.vmem [resolvable:$true] %s172_s28 }
  0x14   : > { %p1403_p4 = pnand %p1019_p1, %p1365_p5  ;;  %s35_s4 = sadd.s32 1, %s1286_s16 }
  0x15   : > { %s1621_s26 = scalar_select %p1385_p12, 1, 0 }
  0x16   : > { %p1006_p13 = pneg %p1385_p12  ;;  %p1408_p6 = scmp.ge.s32.totalorder %s35_s4, 2 }
  0x17   : > { %s1623_s30 = scalar_select %p1403_p4, 1, 0 }
  0x18   : > { %p1397_p2 = pnand %p1006_p13, %p1361_p3  ;;  %s1146_s8 = scalar_lea.hbm %s1606_s0, 256 }
  0x19   : > { %s1624_s5 = scalar_select %p1408_p6, 1, 0 }
  0x1a   : > { %p1147_p10 = scmp.ne.s32.totalorder %s1606_s0, %s1146_s8  ;;  %p1148_p11 = pneg %p1397_p2 }
  0x1b   : > { %p1153_p1 = scmp.lt.u32.totalorder %s1146_s8, %s1606_s0 }
  0x1c   : > { %p1149_p13 = pnand %p1148_p11, %p1147_p10 }
  0x1e   : > { %p1150_p5 = pneg %p1149_p13 }
  0x20   : > { %p1155_p0 = pnand %p1153_p1, %p1150_p5 }
  0x22   : > { %1158 = shalt.err (!%p1155_p0)
}
  0x23   : > { %s1159_s19 = scalar_lea.vmem %s1389_s28, 256  ;;  %p1167_p3 = scmp.lt.s32.totalorder %s1389_s28, %s1389_s28 }
  0x24   : > { %p1160_p9 = scmp.ne.s32.totalorder %s1389_s28, %s1159_s19  ;;  %p1168_p12 = scmp.lt.s32.totalorder %s1159_s19, %s1159_s19 }
  0x26   : > { %p1162_p8 = pnand %p1160_p9, %p1148_p11  ;;  %p1169_p4 = por %p1168_p12, %p1167_p3 }
  0x28   : > { %p1163_p7 = pneg %p1162_p8 }
  0x2a   : > { %p1170_p6 = pnand %p1169_p4, %p1163_p7 }
  0x2c   : > { %1173 = shalt.err (!%p1170_p6)
}
  0x2d   : > { %s1293_s22 = smov 128   ;;  %s1294_s27 = smov 8  }
  0x2e   : > { %1009 = dma.hbm_to_vmem [thread:$0]  (!%p1397_p2), %s1606_s0, 256, %s1389_s28, [#allocation4], %s1293_s22, %s1293_s22, %s1294_s27  }
  0x2f   : > { %s186_s8 = sand.u32 1, %s1278_s14   ;;  %p1625_p3 = scmp.ne.s32.totalorder %s1624_s5, 0 }
  0x30   : > { %s995_s9 = smul.u32 384, %s186_s8  ;;  %s1626_s22 = sadd.s32 1, %s1278_s14 }
  0x31   : > { %s1640_s4 = smov (%p1625_p3, %s35_s4), 0  ;;  %s967_s11 = smul.u32 192, %s1286_s16 }
  0x32   : > { %s72_s10 = ssub.s32 %s1286_s16, %s1640_s4  ;;  %s190_s28 = scalar_lea.vmem [#allocation6], %s995_s9 }
  0x33   : > { %p74_p7 = scmp.eq.s32.totalorder %s72_s10, 0  ;;  %s1444_s20 = scalar_lea.hbm %s1607_s1, %s967_s11 }
  0x34   : > { %s200_s29 = sshll.u32 %s190_s28, 4  ;;  %s1453_s27 = scalar_lea.sflag [#allocation7], %s186_s8  ;;  %s1451_s29 = int_to_ptr.vmem [resolvable:$true] %s200_s29 }
  0x35   : > { %s1449_s5 = scalar_select %p74_p7, %s1278_s14, %s1626_s22  }
  0x36   : > { %s1174_s6 = scalar_lea.hbm %s1444_s20, 6144  ;;  %p1627_p9 = scmp.ne.s32.totalorder %s1623_s30, 0 }
  0x37   : > { %p1175_p8 = scmp.ne.s32.totalorder %s1444_s20, %s1174_s6  ;;  %s1179_s9 = scalar_lea.hbm %s1607_s1, 12288 }
  0x38   : > { %p1176_p12 = pneg %p1627_p9  ;;  %p1180_p4 = scmp.lt.u32.totalorder %s1444_s20, %s1607_s1 }
  0x39   : > { %p1181_p6 = scmp.lt.u32.totalorder %s1179_s9, %s1174_s6  ;;  %p1183_p11 = scmp.lt.u32.totalorder %s1174_s6, %s1444_s20 }
  0x3a   : > { %p1177_p0 = pnand %p1176_p12, %p1175_p8 }
  0x3b   : > { %p1182_p10 = por %p1181_p6, %p1180_p4 }
  0x3c   : > { %p1178_p2 = pneg %p1177_p0 }
  0x3d   : > { %p1184_p13 = por %p1183_p11, %p1182_p10 }
  0x3f   : > { %p1185_p5 = pnand %p1184_p13, %p1178_p2 }
  0x41   : > { %1188 = shalt.err (!%p1185_p5)
}
  0x42   : > { %s1189_s8 = scalar_lea.vmem %s1451_s29, 6144  ;;  %s1295_s19 = smov [#allocation6]  }
  0x43   : > { %p1190_p1 = scmp.ne.s32.totalorder %s1451_s29, %s1189_s8  ;;  %s1194_s28 = sshll.u32 %s1295_s19, 4  ;;  %s1195_s28 = int_to_ptr.vmem [resolvable:$false] %s1194_s28 }
  0x44   : > { %s1196_s22 = scalar_lea.vmem %s1195_s28, 12288  ;;  %p1197_p8 = scmp.lt.s32.totalorder %s1451_s29, %s1195_s28 }
  0x45   : > { %p1192_p3 = pnand %p1190_p1, %p1176_p12  ;;  %p1198_p0 = scmp.lt.s32.totalorder %s1196_s22, %s1189_s8 }
  0x47   : > { %p1193_p7 = pneg %p1192_p3  ;;  %p1199_p4 = por %p1198_p0, %p1197_p8 }
  0x49   : > { %p1200_p6 = pnand %p1199_p4, %p1193_p7 }
  0x4b   : > { %1203 = shalt.err (!%p1200_p6)
}
  0x4c   : > { %s1296_s6 = smov 384   ;;  %s1297_s7 = smov 192  }
  0x4d   : > { %s1298_s10 = smov 12   ;;  %p1628_p12 = scmp.ne.s32.totalorder %s1621_s26, 0 }
  0x4e   : > { %1013 = dma.hbm_to_vmem [thread:$0]  (!%p1627_p9), %s1444_s20, 6144, %s1451_s29, %s1453_s27, %s1296_s6, %s1297_s7, %s1298_s10  }
  0x4f   : > { %220 = sbr.rel (%p1628_p12) target bundleno = 392 (0x188), region = 32  ;;  %p1629_p2 = scmp.ne.s32.totalorder (!%p1628_p12), %s1616_s21, 0 }
  0x56   : > { %1257 = dma.done.wait (%p1629_p2), [#allocation4], 256  }
  0x57   : > { %1259 = vsyncadd (%p1629_p2), [#allocation4], 4294967040  ;;  %s1488_s9 = sand.u32 1, %s1274_s13   ;;  %p1630_p9 = scmp.ne.s32.totalorder %s1618_s23, 0 }
  0x58   : > { %s996_s11 = smul.u32 384, %s1488_s9  ;;  %s227_s18 = scalar_lea.sflag [#allocation7], %s1488_s9 }
  0x5a   : > { %s1492_s8 = scalar_lea.vmem [#allocation6], %s996_s11 }
  0x5b   : > { %1261 = dma.done.wait (%p1630_p9), %s227_s18, 6144  }
  0x5c   : > { %1263 = vsyncadd (%p1630_p9), %s227_s18, 4294961152  ;;  %v1079_v0 = vld [vmem:[%s1492_s8 + $0x4] ss:$12 sps:$4 sm:$0xff]   ;;  %v1081_v1 = vld [vmem:[%s1492_s8] ss:$12 sps:$4 sm:$0xff]   ;;  %s261_s20 = smul.u32 3, %s1282_s15  ;;  %v724_v50 = vlaneseq }
  0x5d   : > { %617 = vmatprep.subr.bf16.mxu0 %v1079_v0  ;;  %v1082_v2 = vld [vmem:[%s1492_s8 + $0x1c] ss:$12 sps:$4 sm:$0xff]   ;;  %v1084_v3 = vld [vmem:[%s1492_s8 + $0x18] ss:$12 sps:$4 sm:$0xff]   ;;  %v1085_v4 = vld [vmem:[%s1492_s8 + $0x34] ss:$12 sps:$4 sm:$0xff]  }
  0x5e   : > { %618 = vmatpush1.bf16.msra.mxu0 %v1081_v1  ;;  %v1087_v5 = vld [vmem:[%s1492_s8 + $0x30] ss:$12 sps:$4 sm:$0xff]   ;;  %v1088_v6 = vld [vmem:[%s1492_s8 + $0x4c] ss:$12 sps:$4 sm:$0xff]   ;;  %v1100_v7 = vld [vmem:[%s1492_s8 + $0xc8] ss:$12 sps:$4 sm:$0xff]  }
  0x5f   : > { %619 = vmatprep.subr.bf16.mxu0 %v1082_v2  ;;  %v1090_v8 = vld [vmem:[%s1492_s8 + $0x48] ss:$12 sps:$4 sm:$0xff]   ;;  %v1091_v9 = vld [vmem:[%s1492_s8 + $0x64] ss:$12 sps:$4 sm:$0xff]   ;;  %973 = vmatprep.subr.bf16.mxu1 %v1100_v7  ;;  %v1105_v11 = vld [vmem:[%s1492_s8 + $0xe0] ss:$12 sps:$4 sm:$0xff]  }
  0x60   : > { %v1103_v10 = vld [vmem:[%s1492_s8 + $0x8] ss:$12 sps:$4 sm:$0xff]   ;;  %v1093_v12 = vld [vmem:[%s1492_s8 + $0x60] ss:$12 sps:$4 sm:$0xff]   ;;  %v1110_v15 = vld [vmem:[%s1492_s8 + $0xf8] ss:$12 sps:$4 sm:$0xff]  }
  0x61   : > { %974 = vmatpush3.bf16.msra.mxu1 %v1103_v10  ;;  %v1094_v13 = vld [vmem:[%s1492_s8 + $0x7c] ss:$12 sps:$4 sm:$0xff]   ;;  %v1108_v14 = vld [vmem:[%s1492_s8 + $0x20] ss:$12 sps:$4 sm:$0xff]   ;;  %v1096_v16 = vld [vmem:[%s1492_s8 + $0x78] ss:$12 sps:$4 sm:$0xff]  }
  0x62   : > { %620 = vmatpush1.bf16.msra.mxu0 %v1084_v3  ;;  %975 = vmatprep.subr.bf16.mxu1 %v1105_v11  ;;  %v1113_v17 = vld [vmem:[%s1492_s8 + $0x38] ss:$12 sps:$4 sm:$0xff]   ;;  %v1097_v18 = vld [vmem:[%s1492_s8 + $0x94] ss:$12 sps:$4 sm:$0xff]   ;;  %v1115_v19 = vld [vmem:[%s1492_s8 + $0x110] ss:$12 sps:$4 sm:$0xff]  }
  0x63   : > { %621 = vmatprep.subr.bf16.mxu0 %v1085_v4  ;;  %v1099_v20 = vld [vmem:[%s1492_s8 + $0x90] ss:$12 sps:$4 sm:$0xff]   ;;  %v1120_v22 = vld [vmem:[%s1492_s8 + $0x128] ss:$12 sps:$4 sm:$0xff]   ;;  %v1101_v23 = vld [vmem:[%s1492_s8 + $0xac] ss:$12 sps:$4 sm:$0xff]  }
  0x64   : > { %v1118_v21 = vld [vmem:[%s1492_s8 + $0x50] ss:$12 sps:$4 sm:$0xff]   ;;  %v1104_v24 = vld [vmem:[%s1492_s8 + $0xa8] ss:$12 sps:$4 sm:$0xff]   ;;  %v1125_v26 = vld [vmem:[%s1492_s8 + $0x140] ss:$12 sps:$4 sm:$0xff]  }
  0x65   : > { %976 = vmatpush3.bf16.msra.mxu1 %v1108_v14  ;;  %v1123_v25 = vld [vmem:[%s1492_s8 + $0x68] ss:$12 sps:$4 sm:$0xff]   ;;  %v1106_v27 = vld [vmem:[%s1492_s8 + $0xc4] ss:$12 sps:$4 sm:$0xff]   ;;  %v1109_v28 = vld [vmem:[%s1492_s8 + $0xc0] ss:$12 sps:$4 sm:$0xff]  }
  0x66   : > { %622 = vmatpush1.bf16.msra.mxu0 %v1087_v5  ;;  %977 = vmatprep.subr.bf16.mxu1 %v1110_v15  ;;  %v1128_v29 = vld [vmem:[%s1492_s8 + $0x80] ss:$12 sps:$4 sm:$0xff]   ;;  %v1130_v30 = vld [vmem:[%s1492_s8 + $0x158] ss:$12 sps:$4 sm:$0xff]   ;;  %v1111_v31 = vld [vmem:[%s1492_s8 + $0xdc] ss:$12 sps:$4 sm:$0xff]  }
  0x67   : > { %623 = vmatprep.subr.bf16.mxu0 %v1088_v6  ;;  %v1133_v32 = vld [vmem:[%s1492_s8 + $0x98] ss:$12 sps:$4 sm:$0xff]   ;;  %v1135_v34 = vld [vmem:[%s1492_s8 + $0x170] ss:$12 sps:$4 sm:$0xff]   ;;  %v1116_v35 = vld [vmem:[%s1492_s8 + $0xf4] ss:$12 sps:$4 sm:$0xff]  }
  0x68   : > { %v1114_v33 = vld [vmem:[%s1492_s8 + $0xd8] ss:$12 sps:$4 sm:$0xff]   ;;  %v1142_v36 = vld [vmem:[#allocation3 + $0x4] ss:$8 sps:$4 sm:$0xff]   ;;  %v1129_v43 = vld [vmem:[%s1492_s8 + $0x120] ss:$12 sps:$4 sm:$0xff]  }
  0x69   : > { %978 = vmatpush3.bf16.msra.mxu1 %v1113_v17  ;;  %v1138_v37 = vld [vmem:[%s1492_s8 + $0xb0] ss:$12 sps:$4 sm:$0xff]   ;;  %v1121_v39 = vld [vmem:[%s1492_s8 + $0x10c] ss:$12 sps:$4 sm:$0xff]   ;;  %692 = vmatprep.mubr.bf16.mxu1 %v1142_v36  ;;  %v1124_v41 = vld [vmem:[%s1492_s8 + $0x108] ss:$12 sps:$4 sm:$0xff]  }
  0x6a   : > { %624 = vmatpush1.bf16.msra.mxu0 %v1090_v8  ;;  %979 = vmatprep.subr.bf16.mxu1 %v1115_v19  ;;  %v1119_v38 = vld [vmem:[%s1492_s8 + $0xf0] ss:$12 sps:$4 sm:$0xff]   ;;  %v1134_v45 = vld [vmem:[%s1492_s8 + $0x138] ss:$12 sps:$4 sm:$0xff]   ;;  %v1136_v46 = vld [vmem:[%s1492_s8 + $0x154] ss:$12 sps:$4 sm:$0xff]  }
  0x6b   : > { %625 = vmatprep.subr.bf16.mxu0 %v1091_v9  ;;  %v1140_v40 = vld [vmem:[#allocation3] ss:$8 sps:$4 sm:$0xff]   ;;  %649 = vmatprep.mubr.bf16.mxu0 %v1142_v36  ;;  %v1131_v44 = vld [vmem:[%s1492_s8 + $0x13c] ss:$12 sps:$4 sm:$0xff]   ;;  %p262_p10 = scmp.lt.s32.totalorder %s261_s20, 5  ;;  %v725_v51 = vshrl.u32 %v724_v50, 7 }
  0x6c   : > { %v1126_v42 = vld [vmem:[%s1492_s8 + $0x124] ss:$12 sps:$4 sm:$0xff]   ;;  %v1143_v48 = vld [vmem:[%s1492_s8 + $0x16c] ss:$12 sps:$4 sm:$0xff]   ;;  %v1145_v49 = vld [vmem:[%s1492_s8 + $0x168] ss:$12 sps:$4 sm:$0xff]  }
  0x6d   : > { %980 = vmatpush3.bf16.msra.mxu1 %v1118_v21  ;;  %v1139_v47 = vld [vmem:[%s1492_s8 + $0x150] ss:$12 sps:$4 sm:$0xff]   ;;  %s1642_s20 = smov (!%p262_p10, %s261_s20), 5  ;;  %v734_v52 = vsub.s32 2, %v725_v51  ;;  %s997_s30 = smul.u32 24, %s1488_s9  ;;  %v726_v1 = vsub.s32 0, %v725_v51 }
  0x6e   : > { %626 = vmatpush1.bf16.msra.mxu0 %v1093_v12  ;;  %981 = vmatprep.subr.bf16.mxu1 %v1120_v22  ;;  %s264_s26 = scalar_lea.vmem %s1608_s2, %s1642_s20  ;;  %v730_v2 = vsub.s32 1, %v725_v51  ;;  %s972_s19 = smul.u32 192, %s1282_s15 }
  0x6f   : > { %627 = vmatprep.subr.bf16.mxu0 %v1094_v13  ;;  %v722_v53 = vld [vmem:[%s264_s26] sm:$0x7]  ;;  %s256_s29 = scalar_lea.vmem [#allocation8], %s997_s30  ;;  %s770_s15 = scalar_lea.sflag [#allocation5], %s1488_s9 }
  0x70   : > { %v735_v55 = vrot.slane %v722_v53, %v734_v52  ;;  %v727_v3 = vrot.slane %v722_v53, %v726_v1  ;;  %v731_v4 = vrot.slane %v722_v53, %v730_v2  ;;  %s786_s27 = sshll.u32 %s256_s29, 4  ;;  %s1557_s6 = scalar_lea.hbm %s1609_s3, %s972_s19  ;;  %s1552_s27 = int_to_ptr.vmem [resolvable:$true] %s786_s27 }
  0x71   : > { %982 = vmatpush3.bf16.msra.mxu1 %v1123_v25  ;;  %s1204_s7 = scalar_lea.vmem %s1552_s27, 384  ;;  %p1631_p13 = scmp.ne.s32.totalorder %s1619_s24, 0 }
  0x72   : > { %628 = vmatpush1.bf16.msra.mxu0 %v1096_v16  ;;  %983 = vmatprep.subr.bf16.mxu1 %v1125_v26  ;;  %p1205_p11 = scmp.ne.s32.totalorder %s1552_s27, %s1204_s7  ;;  %s1299_s10 = smov [#allocation8]  }
  0x73   : > { %629 = vmatprep.subr.bf16.mxu0 %v1097_v18  ;;  %s1208_s11 = sshll.u32 %s1299_s10, 4  ;;  %s1209_s11 = int_to_ptr.vmem [resolvable:$false] %s1208_s11 }
  0x74   : > { %p1206_p5 = pnand %p1205_p11, %p1631_p13  ;;  %s1210_s18 = scalar_lea.vmem %s1209_s11, 768 }
  0x75   : > { %984 = vmatpush3.bf16.msra.mxu1 %v1128_v29  ;;  %p1211_p3 = scmp.lt.s32.totalorder %s1552_s27, %s1209_s11  ;;  %p1212_p7 = scmp.lt.s32.totalorder %s1210_s18, %s1204_s7 }
  0x76   : > { %630 = vmatpush1.bf16.msra.mxu0 %v1099_v20  ;;  %985 = vmatprep.subr.bf16.mxu1 %v1130_v30  ;;  %p1207_p1 = pneg %p1206_p5 }
  0x77   : > { %631 = vmatprep.subr.bf16.mxu0 %v1101_v23  ;;  %p1213_p8 = por %p1212_p7, %p1211_p3 }
  0x79   : > { %986 = vmatpush3.bf16.msra.mxu1 %v1133_v32  ;;  %p1214_p0 = pnand %p1213_p8, %p1207_p1 }
  0x7a   : > { %632 = vmatpush1.bf16.msra.mxu0 %v1104_v24  ;;  %987 = vmatprep.subr.bf16.mxu1 %v1135_v34 }
  0x7b   : > { %633 = vmatprep.subr.bf16.mxu0 %v1106_v27 }
  0x7d   : > { %988 = vmatpush3.bf16.msra.mxu1 %v1138_v37 }
  0x7e   : > { %634 = vmatpush1.bf16.msra.mxu0 %v1109_v28 }
  0x7f   : > { %635 = vmatprep.subr.bf16.mxu0 %v1111_v31 }
  0x80   : > { %693 = vmatmul.mubr.bf16.vlgmr.msra.gmra.mrb[0].mxu1 %v1140_v40 }
  0x82   : > { %636 = vmatpush1.bf16.msra.mxu0 %v1114_v33 }
  0x83   : > { %637 = vmatprep.subr.bf16.mxu0 %v1116_v35 }
  0x86   : > { %638 = vmatpush1.bf16.msra.mxu0 %v1119_v38 }
  0x87   : > { %639 = vmatprep.subr.bf16.mxu0 %v1121_v39 }
  0x8a   : > { %640 = vmatpush1.bf16.msra.mxu0 %v1124_v41 }
  0x8b   : > { %641 = vmatprep.subr.bf16.mxu0 %v1126_v42 }
  0x8e   : > { %642 = vmatpush1.bf16.msra.mxu0 %v1129_v43 }
  0x8f   : > { %643 = vmatprep.subr.bf16.mxu0 %v1131_v44 }
  0x92   : > { %644 = vmatpush1.bf16.msra.mxu0 %v1134_v45 }
  0x93   : > { %645 = vmatprep.subr.bf16.mxu0 %v1136_v46 }
  0x96   : > { %646 = vmatpush1.bf16.msra.mxu0 %v1139_v47 }
  0x97   : > { %647 = vmatprep.subr.bf16.mxu0 %v1143_v48 }
  0x9a   : > { %648 = vmatpush1.bf16.msra.mxu0 %v1145_v49 }
  0x9d   : > { %650 = vmatmul.mubr.bf16.vlgmr.msra.gmra.mrb[0].mxu0 %v1140_v40 }
 0x153   : > { %v989_v54 = vpop.f32.mrb[0].mxu1 }
 0x154   : > { %v990_v56 = vpop.f32.mrb[1].mxu1 }
 0x155   : > { %v991_v57 = vadd.f32 %v990_v56, %v989_v54  ;;  %v992_v58 = vpop.f32.mrb[2].mxu1 }
 0x156   : > { %v993_v59 = vpop.f32.mrb[3].mxu1 }
 0x157   : > { %v741_v60 = vadd.f32 %v991_v57, %v735_v55  ;;  %v994_v61 = vadd.f32 %v993_v59, %v992_v58 }
 0x159   : > { %v969_v62 = vpack.c.bf16 %v741_v60, %v741_v60  ;;  %v744_v63 = vadd.f32 %v994_v61, %v735_v55 }
 0x15b   : > { %766 = vst [vmem:[%s256_s29 + $0x8] sm:$0xf] %v969_v62  ;;  %v971_v0 = vpack.c.bf16 %v744_v63, %v744_v63 }
 0x15d   : > { %768 = vst [vmem:[%s256_s29 + $0x14] sm:$0xf] %v971_v0 }
 0x170   : > { %v651_v5 = vpop.f32.mrb[0].mxu0 }
 0x171   : > { %v739_v6 = vadd.f32 %v727_v3, %v651_v5  ;;  %v653_v7 = vpop.f32.mrb[1].mxu0 }
 0x172   : > { %v740_v8 = vadd.f32 %v731_v4, %v653_v7  ;;  %v655_v9 = vpop.f32.mrb[2].mxu0 }
 0x173   : > { %v742_v10 = vadd.f32 %v727_v3, %v655_v9  ;;  %v657_v11 = vpop.f32.mrb[3].mxu0 }
 0x174   : > { %v968_v12 = vpack.c.bf16 %v740_v8, %v739_v6  ;;  %v743_v13 = vadd.f32 %v731_v4, %v657_v11 }
 0x176   : > { %765 = vst [vmem:[%s256_s29] sm:$0xff] %v968_v12  ;;  %v970_v14 = vpack.c.bf16 %v743_v13, %v742_v10 }
 0x178   : > { %767 = vst [vmem:[%s256_s29 + $0xc] sm:$0xff] %v970_v14 }
 0x179   : > { %1217 = shalt.err (!%p1214_p0)
}
 0x17a   : > { %s1218_s8 = scalar_lea.hbm %s1557_s6, 384  ;;  %s1222_s23 = scalar_lea.hbm %s1609_s3, 768 }
 0x17b   : > { %p1219_p4 = scmp.ne.s32.totalorder %s1557_s6, %s1218_s8  ;;  %p1223_p2 = scmp.lt.u32.totalorder %s1557_s6, %s1609_s3 }
 0x17c   : > { %p1224_p9 = scmp.lt.u32.totalorder %s1222_s23, %s1218_s8  ;;  %p1226_p11 = scmp.lt.u32.totalorder %s1218_s8, %s1557_s6 }
 0x17d   : > { %p1220_p6 = pnand %p1219_p4, %p1631_p13 }
 0x17e   : > { %p1225_p10 = por %p1224_p9, %p1223_p2 }
 0x17f   : > { %p1221_p12 = pneg %p1220_p6 }
 0x180   : > { %p1227_p5 = por %p1226_p11, %p1225_p10 }
 0x182   : > { %p1228_p1 = pnand %p1227_p5, %p1221_p12 }
 0x184   : > { %1231 = shalt.err (!%p1228_p1)
}
 0x185   : > { %s1300_s29 = smov 192   ;;  %s1301_s19 = smov 384  }
 0x186   : > { %s1302_s28 = smov 12  }
 0x187   : > { %1004 = dma.vmem_to_hbm [thread:$0]  (%p1631_p13), %s1552_s27, 384, %s1557_s6, %s770_s15, %s1300_s29, %s1301_s19, %s1302_s28  }
 0x188 PF: > { %s801_s22 = sand.u32 1, %s1270_s12   ;;  %p1632_p3 = scmp.ne.s32.totalorder %s1620_s25, 0 }
 0x189   : > { %p1633_p7 = scmp.ge.s32.totalorder %s1290_s17, 2  ;;  %s802_s7 = scalar_lea.sflag [#allocation5], %s801_s22 }
 0x18b   : > { %p1015_p8 = pnand %p1633_p7, %p1632_p3 }
 0x18d   : > { %1265 = dma.done.wait (!%p1015_p8), %s802_s7, 384  }
 0x18e   : > { %1267 = vsyncadd (!%p1015_p8), %s802_s7, 4294966912  ;;  %s20_s17 = sadd.s32 1, %s1290_s17   ;;  %s1634_s12 = smov %s1274_s13 }
 0x18f   : > { %p17_p0 = scmp.ge.s32.totalorder %s20_s17, 4   ;;  %s1635_s13 = smov %s1278_s14 }
 0x190   : > { %s1636_s14 = smov %s1449_s5  ;;  %s1637_s15 = smov %s1286_s16 }
 0x191   : > { %s1638_s16 = smov %s1640_s4  ;;  %19 = sbr.rel (!%p17_p0) target bundleno = 7 (0x7), region = 94 }
 0x198   :  { %807 = vsyncpa [#allocation4], 1 }
 0x199   :  { %809 = vsyncpa [#allocation4 + $0x1], 1 }
 0x19a   :  { %810 = vsyncpa [#allocation7], 1 }
 0x19b   :  { %812 = vsyncpa [#allocation7 + $0x1], 1 }
 0x19c   :  { %813 = vsyncpa [#allocation5], 1 }
 0x19d   :  { %815 = vsyncpa [#allocation5 + $0x1], 1 }

</bundles_post_ra>
